<compile_context>
chip_gen: v7x
topology: tpu7x:2x2x1
jax: 0.10.0
libtpu: 0.0.40
codegen_flags: <defaults>
</compile_context>

<pallas_src>
import functools
import math

import jax
import jax.numpy as jnp
from jax.experimental import pallas as pl
from jax.experimental.pallas import tpu as pltpu


# ---------------------------------------------------------------------------
# LoRA linear kernel:  y = x @ Wt + (x @ At) @ Bt_scaled   [optionally * sigmoid(gate)]
# Weights arrive pre-transposed: Wt (K, N), At (K, r), Bt_scaled (r, N).
# Grid = (M/tm, N/tn, K/tk); f32 accumulators in VMEM; finalize on last K step.
# ---------------------------------------------------------------------------
def _make_lora_kernel(gated):
    def kernel(x_ref, wt_ref, at_ref, bt_ref, *rest):
        if gated:
            gate_ref, o_ref, acc_ref, xa_ref = rest
        else:
            o_ref, acc_ref, xa_ref = rest

        k = pl.program_id(2)

        @pl.when(k == 0)
        def _():
            acc_ref[...] = jnp.zeros_like(acc_ref)
            xa_ref[...] = jnp.zeros_like(xa_ref)

        x = x_ref[...]
        # Base path: x @ Wt  (no in-kernel transpose)
        acc_ref[...] += jnp.dot(x, wt_ref[...], preferred_element_type=jnp.float32)
        # LoRA down-projection: x @ At -> (tm, rank)
        xa_ref[...] += jnp.dot(x, at_ref[...], preferred_element_type=jnp.float32)

        @pl.when(k == pl.num_programs(2) - 1)
        def _():
            y = acc_ref[...] + jnp.dot(
                xa_ref[...], bt_ref[...], preferred_element_type=jnp.float32)
            if gated:
                g = gate_ref[...].astype(jnp.float32)
                y = y * (1.0 / (1.0 + jnp.exp(-g)))   # sigmoid gate, f32 epilogue
            o_ref[...] = y.astype(o_ref.dtype)

    return kernel


def _round_up(x, m):
    return (x + m - 1) // m * m


def lora_linear(x2, w_t, a_t, bt_scaled, gate=None, *, tm=256):
    """x2: (M, K); w_t: (K, N); a_t: (K, r); bt_scaled: (r, N); gate: (M, N) or None."""
    M, K = x2.shape
    N = w_t.shape[1]
    rank = a_t.shape[1]

    # Tile selection (sweepable).  Fall back to full extents for odd sizes.
    tm = min(tm, _round_up(M, 8))
    tn = 256 if N % 256 == 0 else (128 if N % 128 == 0 else N)
    tk = 512 if K % 512 == 0 else (256 if K % 256 == 0 else K)

    # Pad M with zero rows instead of asserting divisibility.
    m_pad = _round_up(M, tm)
    if m_pad != M:
        x2 = jnp.pad(x2, ((0, m_pad - M), (0, 0)))
        if gate is not None:
            gate = jnp.pad(gate, ((0, m_pad - M), (0, 0)))

    grid = (m_pad // tm, N // tn, K // tk)

    in_specs = [
        pl.BlockSpec((tm, tk), lambda i, j, k: (i, k)),      # x tile
        pl.BlockSpec((tk, tn), lambda i, j, k: (k, j)),      # Wt tile
        pl.BlockSpec((tk, rank), lambda i, j, k: (k, 0)),    # At tile
        pl.BlockSpec((rank, tn), lambda i, j, k: (0, j)),    # Bt (scaled) tile
    ]
    args = [x2, w_t, a_t, bt_scaled]
    if gate is not None:
        in_specs.append(pl.BlockSpec((tm, tn), lambda i, j, k: (i, j)))
        args.append(gate)

    out = pl.pallas_call(
        _make_lora_kernel(gate is not None),
        out_shape=jax.ShapeDtypeStruct((m_pad, N), x2.dtype),
        grid_spec=pltpu.PrefetchScalarGridSpec(
            num_scalar_prefetch=0,
            grid=grid,
            in_specs=in_specs,
            out_specs=pl.BlockSpec((tm, tn), lambda i, j, k: (i, j)),
            scratch_shapes=[
                pltpu.VMEM((tm, tn), jnp.float32),     # base accumulator
                pltpu.VMEM((tm, rank), jnp.float32),   # x @ At accumulator
            ],
        ),
        compiler_params=pltpu.CompilerParams(
            dimension_semantics=("parallel", "parallel", "arbitrary")),
    )(*args)

    return out[:M]


# ---------------------------------------------------------------------------
# RoPE + softmax attention kernel.  Grid over batch; all heads processed per
# step with batched einsums (S, D small in this example).
# ---------------------------------------------------------------------------
def _attn_rope_kernel(q_ref, k_ref, v_ref, cos_ref, sin_ref, o_ref, *, scale):
    q = q_ref[0].astype(jnp.float32)        # (H, S, D)
    k = k_ref[0].astype(jnp.float32)
    v = v_ref[0].astype(jnp.float32)
    cos = cos_ref[...][None, :, :]          # (1, S, D)
    sin = sin_ref[...][None, :, :]
    half = q.shape[-1] // 2

    def rot_half(t):                        # cat((-x2, x1), -1)
        return jnp.concatenate([-t[..., half:], t[..., :half]], axis=-1)

    q_r = q * cos + rot_half(q) * sin
    k_r = k * cos + rot_half(k) * sin

    # q_r @ k_r^T without an explicit transpose (contract last dims).
    scores = jnp.einsum("hqd,hkd->hqk", q_r, k_r,
                        preferred_element_type=jnp.float32) * scale
    m = jnp.max(scores, axis=-1, keepdims=True)
    p = jnp.exp(scores - m)
    attn = p / jnp.sum(p, axis=-1, keepdims=True)
    out = jnp.einsum("hqk,hkd->hqd", attn, v, preferred_element_type=jnp.float32)
    o_ref[0] = out.astype(o_ref.dtype)


def rope_attention(q, k, v, cos, sin):
    """q/k/v: (B, H, S, D); cos/sin: (S, D) already laid out as [c,c]/[s,s]."""
    B, H, S, D = q.shape
    kernel = functools.partial(_attn_rope_kernel, scale=1.0 / math.sqrt(D))
    return pl.pallas_call(
        kernel,
        out_shape=jax.ShapeDtypeStruct((B, H, S, D), q.dtype),
        grid_spec=pltpu.PrefetchScalarGridSpec(
            num_scalar_prefetch=0,
            grid=(B,),
            in_specs=[
                pl.BlockSpec((1, H, S, D), lambda b: (b, 0, 0, 0)),
                pl.BlockSpec((1, H, S, D), lambda b: (b, 0, 0, 0)),
                pl.BlockSpec((1, H, S, D), lambda b: (b, 0, 0, 0)),
                pl.BlockSpec((S, D), lambda b: (0, 0)),
                pl.BlockSpec((S, D), lambda b: (0, 0)),
            ],
            out_specs=pl.BlockSpec((1, H, S, D), lambda b: (b, 0, 0, 0)),
        ),
        compiler_params=pltpu.CompilerParams(dimension_semantics=("parallel",)),
    )(q, k, v, cos, sin)


# ---------------------------------------------------------------------------
# GatedAttentionUnit forward (eval mode, attention_mask=None)
# ---------------------------------------------------------------------------
def gated_attention_unit(x, w_qkv, a_qkv, b_qkv, w_gate, w_out, a_out, b_out,
                         *, num_heads, alpha):
    B, S, H = x.shape
    D = H // num_heads
    rank = a_qkv.shape[0]
    scaling = alpha / rank

    # Pre-transpose weights once (done in HBM by XLA, not inside the kernel)
    # and fold the LoRA scaling into B.  Fuse qkv_proj + gate_proj into one
    # GEMM by concatenating along the output dim (gate gets a zero LoRA-B).
    w_big_t = jnp.concatenate([w_qkv, w_gate], axis=0).T                 # (H, 4H)
    a_qkv_t = a_qkv.T                                                    # (H, r)
    b_big_t = jnp.concatenate(
        [scaling * b_qkv.T, jnp.zeros((rank, H), b_qkv.dtype)], axis=1)  # (r, 4H)

    x2 = x.reshape(-1, H)                                                # (M, H)
    y = lora_linear(x2, w_big_t, a_qkv_t, b_big_t)                       # (M, 4H)
    qkv, gate_logits = y[:, :3 * H], y[:, 3 * H:]

    def to_heads(t):   # (M, H) -> (B, num_heads, S, D)   (layout plumbing)
        return t.reshape(B, S, num_heads, D).transpose(0, 2, 1, 3)

    q = to_heads(qkv[:, :H])
    k = to_heads(qkv[:, H:2 * H])
    v = to_heads(qkv[:, 2 * H:])

    # RoPE tables, precomputed once like the module's cached buffers.
    inv_freq = 1.0 / (10000.0 ** (jnp.arange(0, D, 2, dtype=jnp.float32) / D))
    freqs = jnp.arange(S, dtype=jnp.float32)[:, None] * inv_freq[None, :]
    cos = jnp.concatenate([jnp.cos(freqs), jnp.cos(freqs)], axis=-1)     # (S, D)
    sin = jnp.concatenate([jnp.sin(freqs), jnp.sin(freqs)], axis=-1)

    attn = rope_attention(q, k, v, cos, sin)                             # (B,H,S,D)
    attn = attn.transpose(0, 2, 1, 3).reshape(B * S, H)

    out = lora_linear(attn, w_out.T, a_out.T, scaling * b_out.T,
                      gate=gate_logits)                                  # (M, H)
    return out.reshape(B, S, H)


# ---------------------------------------------------------------------------
# Pure-JAX reference (eval-mode PyTorch semantics)
# ---------------------------------------------------------------------------
def reference_gau(x, w_qkv, a_qkv, b_qkv, w_gate, w_out, a_out, b_out,
                  *, num_heads, alpha):
    B, S, H = x.shape
    D = H // num_heads
    rank = a_qkv.shape[0]
    scaling = alpha / rank

    def lora(t, w, a, b):
        return t @ w.T + scaling * ((t @ a.T) @ b.T)

    qkv = lora(x, w_qkv, a_qkv, b_qkv)
    gate = 1.0 / (1.0 + jnp.exp(-(x @ w_gate.T)))
    q, k, v = jnp.split(qkv, 3, axis=-1)

    def to_heads(t):
        return t.reshape(B, S, num_heads, D).transpose(0, 2, 1, 3)

    q, k, v = to_heads(q), to_heads(k), to_heads(v)

    inv_freq = 1.0 / (10000.0 ** (jnp.arange(0, D, 2, dtype=jnp.float32) / D))
    freqs = jnp.arange(S, dtype=jnp.float32)[:, None] * inv_freq[None, :]
    cos = jnp.concatenate([jnp.cos(freqs), jnp.cos(freqs)], axis=-1)[None, None]
    sin = jnp.concatenate([jnp.sin(freqs), jnp.sin(freqs)], axis=-1)[None, None]

    def rot_half(t):
        t1, t2 = jnp.split(t, 2, axis=-1)
        return jnp.concatenate([-t2, t1], axis=-1)

    q = q * cos + rot_half(q) * sin
    k = k * cos + rot_half(k) * sin

    scores = jnp.einsum("bhqd,bhkd->bhqk", q, k) / math.sqrt(D)
    attn = jax.nn.softmax(scores, axis=-1)
    out = jnp.einsum("bhqk,bhkd->bhqd", attn, v)
    out = out.transpose(0, 2, 1, 3).reshape(B, S, H)
    return lora(out, w_out, a_out, b_out) * gate


if __name__ == "__main__":
    batch, seq = 2, 16
    hidden, num_heads = 128, 4          # head_dim = 32
    rank, alpha = 16, 32

    key = jax.random.PRNGKey(0)
    ks = jax.random.split(key, 8)
    scale_w = 1.0 / math.sqrt(hidden)   # keep activations O(1) for the check

    x = jax.random.normal(ks[0], (batch, seq, hidden), jnp.float32)
    w_qkv = jax.random.normal(ks[1], (3 * hidden, hidden), jnp.float32) * scale_w
    w_gate = jax.random.normal(ks[2], (hidden, hidden), jnp.float32) * scale_w
    w_out = jax.random.normal(ks[3], (hidden, hidden), jnp.float32) * scale_w

    # kaiming_uniform_(a=sqrt(5)):  U(-b, b), b = sqrt(6 / ((1 + a^2) * fan_in))
    bound = math.sqrt(6.0 / ((1.0 + 5.0) * hidden))
    a_qkv = jax.random.uniform(ks[4], (rank, hidden), jnp.float32, -bound, bound)
    a_out = jax.random.uniform(ks[5], (rank, hidden), jnp.float32, -bound, bound)
    # lora_B is zero-initialized in the module; use small non-zero values so
    # the LoRA path actually contributes to the numerical check.
    b_qkv = jax.random.normal(ks[6], (3 * hidden, rank), jnp.float32) * 0.02
    b_out = jax.random.normal(ks[7], (hidden, rank), jnp.float32) * 0.02

    out = gated_attention_unit(x, w_qkv, a_qkv, b_qkv, w_gate, w_out, a_out, b_out,
                               num_heads=num_heads, alpha=alpha)
    out = jax.block_until_ready(out)

    ref = reference_gau(x, w_qkv, a_qkv, b_qkv, w_gate, w_out, a_out, b_out,
                        num_heads=num_heads, alpha=alpha)

    assert out.shape == (batch, seq, hidden)
    assert jnp.allclose(out, ref, atol=2e-3, rtol=2e-3), "mismatch vs reference"

    print("KERNEL_OK")
</pallas_src>

<mosaic_0001>
module attributes {stable_mosaic.version = 11 : i64} {
  func.func @kernel(%arg0: i32, %arg1: i32, %arg2: i32, %arg3: memref<32x128xf32, #tpu.memory_space<vmem>>, %arg4: memref<128x256xf32, #tpu.memory_space<vmem>>, %arg5: memref<128x16xf32, #tpu.memory_space<vmem>>, %arg6: memref<16x256xf32, #tpu.memory_space<vmem>>, %arg7: memref<32x256xf32, #tpu.memory_space<vmem>>, %arg8: memref<32x256xf32, #tpu.memory_space<vmem>>, %arg9: memref<32x16xf32, #tpu.memory_space<vmem>>) attributes {dimension_semantics = [#tpu.dimension_semantics<parallel>, #tpu.dimension_semantics<parallel>, #tpu.dimension_semantics<arbitrary>], iteration_bounds = array<i64: 1, 2, 1>, scalar_prefetch = 0 : i64, scratch_operands = 2 : i64, tpu.core_type = #tpu.core_type<tc>, window_params = [{transform_indices = @transform_0, window_bounds = array<i64: 32, 128>}, {transform_indices = @transform_1, window_bounds = array<i64: 128, 256>}, {transform_indices = @transform_2, window_bounds = array<i64: 128, 16>}, {transform_indices = @transform_3, window_bounds = array<i64: 16, 256>}, {transform_indices = @transform_4, window_bounds = array<i64: 32, 256>}]} {
    %c0_i32 = arith.constant 0 : i32
    %0 = arith.cmpi eq, %arg2, %c0_i32 : i32
    %1 = arith.extui %0 : i1 to i32
    %c0_i32_0 = arith.constant 0 : i32
    %2 = arith.cmpi ne, %1, %c0_i32_0 : i32
    scf.if %2 {
      %cst_17 = arith.constant 0.000000e+00 : f32
      %17 = vector.broadcast %cst_17 : f32 to vector<32x256xf32>
      %c0_18 = arith.constant 0 : index
      %c0_19 = arith.constant 0 : index
      %18 = vector.load %arg8[%c0_18, %c0_19] : memref<32x256xf32, #tpu.memory_space<vmem>>, vector<32x256xf32>
      tpu.vector_store %arg8[%c0_18, %c0_19], %17 {strides = array<i32>} : memref<32x256xf32, #tpu.memory_space<vmem>>, vector<32x256xf32>,
      %cst_20 = arith.constant 0.000000e+00 : f32
      %19 = vector.broadcast %cst_20 : f32 to vector<32x16xf32>
      %c0_21 = arith.constant 0 : index
      %c0_22 = arith.constant 0 : index
      %20 = vector.load %arg9[%c0_21, %c0_22] : memref<32x16xf32, #tpu.memory_space<vmem>>, vector<32x16xf32>
      tpu.vector_store %arg9[%c0_21, %c0_22], %19 {strides = array<i32>} : memref<32x16xf32, #tpu.memory_space<vmem>>, vector<32x16xf32>,
    } else {
    }
    %c0 = arith.constant 0 : index
    %c0_1 = arith.constant 0 : index
    %3 = vector.load %arg3[%c0, %c0_1] : memref<32x128xf32, #tpu.memory_space<vmem>>, vector<32x128xf32>
    %c0_2 = arith.constant 0 : index
    %c0_3 = arith.constant 0 : index
    %4 = vector.load %arg8[%c0_2, %c0_3] : memref<32x256xf32, #tpu.memory_space<vmem>>, vector<32x256xf32>
    %c0_4 = arith.constant 0 : index
    %c0_5 = arith.constant 0 : index
    %5 = vector.load %arg4[%c0_4, %c0_5] : memref<128x256xf32, #tpu.memory_space<vmem>>, vector<128x256xf32>
    %cst = arith.constant dense<0.000000e+00> : vector<32x256xf32>
    %6 = tpu.matmul %3, %5, %cst {dimension_numbers = #tpu.dot_dimension_numbers<[1], [0], [0], [1], [0, 0, 1, 1], [], []>} : vector<32x128xf32>, vector<128x256xf32>, vector<32x256xf32> -> vector<32x256xf32>
    %7 = arith.addf %4, %6 : vector<32x256xf32>
    %c0_6 = arith.constant 0 : index
    %c0_7 = arith.constant 0 : index
    %8 = vector.load %arg8[%c0_6, %c0_7] : memref<32x256xf32, #tpu.memory_space<vmem>>, vector<32x256xf32>
    tpu.vector_store %arg8[%c0_6, %c0_7], %7 {strides = array<i32>} : memref<32x256xf32, #tpu.memory_space<vmem>>, vector<32x256xf32>,
    %c0_8 = arith.constant 0 : index
    %c0_9 = arith.constant 0 : index
    %9 = vector.load %arg9[%c0_8, %c0_9] : memref<32x16xf32, #tpu.memory_space<vmem>>, vector<32x16xf32>
    %c0_10 = arith.constant 0 : index
    %c0_11 = arith.constant 0 : index
    %10 = vector.load %arg5[%c0_10, %c0_11] : memref<128x16xf32, #tpu.memory_space<vmem>>, vector<128x16xf32>
    %cst_12 = arith.constant dense<0.000000e+00> : vector<32x16xf32>
    %11 = tpu.matmul %3, %10, %cst_12 {dimension_numbers = #tpu.dot_dimension_numbers<[1], [0], [0], [1], [0, 0, 1, 1], [], []>} : vector<32x128xf32>, vector<128x16xf32>, vector<32x16xf32> -> vector<32x16xf32>
    %12 = arith.addf %9, %11 : vector<32x16xf32>
    %c0_13 = arith.constant 0 : index
    %c0_14 = arith.constant 0 : index
    %13 = vector.load %arg9[%c0_13, %c0_14] : memref<32x16xf32, #tpu.memory_space<vmem>>, vector<32x16xf32>
    tpu.vector_store %arg9[%c0_13, %c0_14], %12 {strides = array<i32>} : memref<32x16xf32, #tpu.memory_space<vmem>>, vector<32x16xf32>,
    %c0_i32_15 = arith.constant 0 : i32
    %14 = arith.cmpi eq, %arg2, %c0_i32_15 : i32
    %15 = arith.extui %14 : i1 to i32
    %c0_i32_16 = arith.constant 0 : i32
    %16 = arith.cmpi ne, %15, %c0_i32_16 : i32
    scf.if %16 {
      %c0_17 = arith.constant 0 : index
      %c0_18 = arith.constant 0 : index
      %17 = vector.load %arg8[%c0_17, %c0_18] : memref<32x256xf32, #tpu.memory_space<vmem>>, vector<32x256xf32>
      %c0_19 = arith.constant 0 : index
      %c0_20 = arith.constant 0 : index
      %18 = vector.load %arg9[%c0_19, %c0_20] : memref<32x16xf32, #tpu.memory_space<vmem>>, vector<32x16xf32>
      %c0_21 = arith.constant 0 : index
      %c0_22 = arith.constant 0 : index
      %19 = vector.load %arg6[%c0_21, %c0_22] : memref<16x256xf32, #tpu.memory_space<vmem>>, vector<16x256xf32>
      %cst_23 = arith.constant dense<0.000000e+00> : vector<32x256xf32>
      %20 = tpu.matmul %18, %19, %cst_23 {dimension_numbers = #tpu.dot_dimension_numbers<[1], [0], [0], [1], [0, 0, 1, 1], [], []>} : vector<32x16xf32>, vector<16x256xf32>, vector<32x256xf32> -> vector<32x256xf32>
      %21 = arith.addf %17, %20 : vector<32x256xf32>
      %c0_24 = arith.constant 0 : index
      %c0_25 = arith.constant 0 : index
      %22 = vector.load %arg7[%c0_24, %c0_25] : memref<32x256xf32, #tpu.memory_space<vmem>>, vector<32x256xf32>
      tpu.vector_store %arg7[%c0_24, %c0_25], %21 {strides = array<i32>} : memref<32x256xf32, #tpu.memory_space<vmem>>, vector<32x256xf32>,
    } else {
    }
    return
  }
  func.func @transform_0(%arg0: i32, %arg1: i32, %arg2: i32) -> (i32, i32) {
    %c0_i32 = arith.constant 0 : i32
    return %arg0, %arg2 : i32, i32
  }
  func.func @transform_1(%arg0: i32, %arg1: i32, %arg2: i32) -> (i32, i32) {
    %c0_i32 = arith.constant 0 : i32
    return %arg2, %arg1 : i32, i32
  }
  func.func @transform_2(%arg0: i32, %arg1: i32, %arg2: i32) -> (i32, i32) {
    %c0_i32 = arith.constant 0 : i32
    %c0_i32_0 = arith.constant 0 : i32
    return %arg2, %c0_i32 : i32, i32
  }
  func.func @transform_3(%arg0: i32, %arg1: i32, %arg2: i32) -> (i32, i32) {
    %c0_i32 = arith.constant 0 : i32
    %c0_i32_0 = arith.constant 0 : i32
    return %c0_i32, %arg1 : i32, i32
  }
  func.func @transform_4(%arg0: i32, %arg1: i32, %arg2: i32) -> (i32, i32) {
    %c0_i32 = arith.constant 0 : i32
    return %arg0, %arg1 : i32, i32
  }
}

</mosaic_0001>

<bundles_post_ra>
// kernel: tpu_custom_call.1
= control target key start
LH: loop header
LB: loop body
LE: loop exit
PB: predicated region body
PF: predicated region fallthrough
CT: control target
= control target key end

     0   :  { %9 = vsyncpa [#allocation5], 0  ;;  %s1594_s0 = inlined_call_operand.vmem [shape: f32[32,128], index: 0, kind: input, shape index: {}]   ;;  %s1595_s1 = inlined_call_operand.hbm [shape: f32[128,512], index: 1, kind: input, shape index: {}]   ;;  %s1596_s2 = inlined_call_operand.vmem [shape: f32[128,16], index: 2, kind: input, shape index: {}]   ;;  %s1597_s3 = inlined_call_operand.vmem [shape: f32[16,512], index: 3, kind: input, shape index: {}]   ;;  %s1598_s4 = inlined_call_operand.hbm [shape: f32[32,512], index: 4, kind: output, shape index: {}]  }
   0x1   :  { %11 = vsyncpa [#allocation5 + $0x1], 0 }
   0x2   :  { %12 = vsyncpa [#allocation6], 0 }
   0x3   :  { %14 = vsyncpa [#allocation6 + $0x1], 0  ;;  %s1296_s15 = smov 0   ;;  %s1298_s16 = smov 0  }
   0x4   :  { %s1300_s17 = smov 0   ;;  %s1302_s18 = smov 0  }
   0x5   :  { %s1304_s19 = smov 0   ;;  %s1306_s20 = smov 0  }
   0x6 LB: > { %s922_s21 = sadd.s32 4294967295, %s1260_s20   ;;  %s923_s22 = sadd.s32 4294967294, %s1260_s20   ;;  %s1260_s20 = sphi %s1306_s20, %s20_s20   ;;  %s1256_s19 = sphi %s1304_s19, %s1612_s19   ;;  %s1252_s18 = sphi %s1302_s18, %s1611_s18   ;;  %s1248_s17 = sphi %s1300_s17, %s1610_s17   ;;  %s1244_s16 = sphi %s1298_s16, %s1609_s16   ;;  %s1240_s15 = sphi %s1296_s15, %s1608_s15  }
   0x7   : > { %s35_s23 = sadd.s32 1, %s1256_s19  ;;  %s76_s24 = sadd.s32 1, %s1248_s17 }
   0x8   : > { %p37_p0 = scmp.ge.s32.totalorder %s35_s23, 2  ;;  %p83_p1 = scmp.ne.s32.totalorder %s1248_s17, %s1244_s16 }
   0x9   : > { %p84_p2 = scmp.eq.s32.totalorder %s1260_s20, 0  ;;  %p89_p3 = scmp.ne.s32.totalorder %s1244_s16, %s1240_s15 }
   0xa   : > { %s1614_s23 = smov (%p37_p0, %s35_s23), 0  ;;  %p90_p5 = scmp.eq.s32.totalorder %s922_s21, 0 }
   0xb   : > { %p1337_p4 = por %p84_p2, %p83_p1  ;;  %s72_s26 = ssub.s32 %s1256_s19, %s1614_s23 }
   0xc   : > { %p167_p6 = scmp.eq.s32.totalorder %s922_s21, 1  ;;  %p74_p7 = scmp.eq.s32.totalorder %s72_s26, 0 }
   0xd   : > { %p1343_p8 = por %p90_p5, %p89_p3  ;;  %p173_p10 = scmp.eq.s32.totalorder %s923_s22, 1 }
   0xe   : > { %p1347_p9 = por %p167_p6, %p83_p1  ;;  %p1599_p12 = scmp.ge.s32.totalorder %s1260_s20, 2 }
   0xf   : > { %s1352_s29 = scalar_select %p74_p7, %s1248_s17, %s76_s24  }
  0x10   : > { %s1603_s28 = scalar_select %p1347_p9, 1, 0 }
  0x11   : > { %p1354_p11 = por %p173_p10, %p89_p3  ;;  %210 = sbr.rel (%p1599_p12) target bundleno = 51 (0x33), region = 24 }
  0x12   : > { %s1362_s5 = sand.u32 (!%p1599_p12), 1, %s1248_s17   ;;  %s947_s6 = sshll.u32 (!%p1599_p12), %s1256_s19, 8 }
  0x13   : > { %s1604_s30 = scalar_select %p1354_p11, 1, 0 }
  0x14   : > { %s928_s7 = sshll.u32 (!%p1599_p12), %s1362_s5, 8  ;;  %s1369_s10 = scalar_lea.hbm (!%p1599_p12), %s1595_s1, %s947_s6 }
  0x15   : > { %s218_s11 = scalar_lea.vmem (!%p1599_p12), [#allocation4], %s928_s7  ;;  %s215_s13 = scalar_lea.sflag (!%p1599_p12), [#allocation5], %s1362_s5 }
  0x16   : > { %s228_s12 = sshll.u32 (!%p1599_p12), %s218_s11, 4  ;;  %s1150_s14 = scalar_lea.hbm (!%p1599_p12), %s1369_s10, 4096  ;;  %s1371_s12 = int_to_ptr.vmem [resolvable:$true] %s228_s12 }
  0x17   : > { %p1151_p13 = scmp.ne.s32.totalorder (!%p1599_p12), %s1369_s10, %s1150_s14  ;;  %s1154_s24 = scalar_lea.hbm (!%p1599_p12), %s1595_s1, 8192 }
  0x18   : > { %p1155_p2 = scmp.lt.u32.totalorder %s1369_s10, %s1595_s1  ;;  %p1156_p3 = scmp.lt.u32.totalorder %s1154_s24, %s1150_s14 }
  0x19   : > { %p1152_p0 = pnand %p1151_p13, %p1337_p4  ;;  %p1158_p6 = scmp.lt.u32.totalorder %s1150_s14, %s1369_s10 }
  0x1a   : > { %p1157_p5 = por %p1156_p3, %p1155_p2 }
  0x1b   : > { %p1153_p1 = pneg %p1152_p0 }
  0x1c   : > { %p1159_p7 = por %p1158_p6, %p1157_p5 }
  0x1e   : > { %p1160_p10 = pnand %p1159_p7, %p1153_p1 }
  0x20   : > { %1163 = shalt.err (!%p1160_p10)
}
  0x21   : > { %s1164_s7 = scalar_lea.vmem %s1371_s12, 4096  ;;  %s1262_s8 = smov [#allocation4]  }
  0x22   : > { %p1165_p13 = scmp.ne.s32.totalorder %s1371_s12, %s1164_s7  ;;  %s1168_s9 = sshll.u32 %s1262_s8, 4  ;;  %s1169_s9 = int_to_ptr.vmem [resolvable:$false] %s1168_s9 }
  0x23   : > { %s1170_s11 = scalar_lea.vmem %s1169_s9, 8192  ;;  %p1171_p11 = scmp.lt.s32.totalorder %s1371_s12, %s1169_s9 }
  0x24   : > { %p1166_p0 = pnand %p1165_p13, %p1337_p4  ;;  %p1172_p9 = scmp.lt.s32.totalorder %s1170_s11, %s1164_s7 }
  0x26   : > { %p1167_p12 = pneg %p1166_p0  ;;  %p1173_p2 = por %p1172_p9, %p1171_p11 }
  0x28   : > { %p1174_p3 = pnand %p1173_p2, %p1167_p12 }
  0x2a   : > { %1177 = shalt.err (!%p1174_p3)
}
  0x2b   : > { %s1263_s14 = smov 512   ;;  %s1264_s21 = smov 256  }
  0x2c   : > { %s1265_s22 = smov 16   ;;  %237 = sbr.rel (!%p1337_p4) target bundleno = 51 (0x33), region = 32 }
  0x2d   : > { %1086 = dma.hbm_to_vmem [thread:$0]  (%p1337_p4), %s1369_s10, 4096, %s1371_s12, %s215_s13, %s1263_s14, %s1264_s21, %s1265_s22  }
  0x2e   : > { %s931_s24 = sshll.u32 (%p1337_p4), %s1362_s5, 5  ;;  %s948_s26 = sshll.u32 (%p1337_p4), %s1256_s19, 4 }
  0x2f   : > { %s244_s8 = scalar_lea.vmem (%p1337_p4), %s1597_s3, %s948_s26  ;;  %s241_s9 = scalar_lea.vmem (%p1337_p4), [#allocation7], %s931_s24 }
  0x30   : > { %v257_v0 = vld [vmem:[%s244_s8] sm:$0xff] (%p1337_p4)  ;;  %v259_v1 = vld [vmem:[%s244_s8 + $0x8] sm:$0xff] (%p1337_p4) }
  0x31   : > { %v261_v2 = vld [vmem:[%s244_s8 + $0x20] sm:$0xff] (%p1337_p4)  ;;  %258 = vst [vmem:[%s241_s9] sm:$0xff] (%p1337_p4), %v257_v0  ;;  %260 = vst [vmem:[%s241_s9 + $0x8] sm:$0xff] (%p1337_p4), %v259_v1  ;;  %v263_v3 = vld [vmem:[%s244_s8 + $0x28] sm:$0xff] (%p1337_p4) }
  0x32   : > { %262 = vst [vmem:[%s241_s9 + $0x10] sm:$0xff] (%p1337_p4), %v261_v2  ;;  %264 = vst [vmem:[%s241_s9 + $0x18] sm:$0xff] (%p1337_p4), %v263_v3 }
  0x33 PF: > { %p934_p4 = scmp.ge.s32.totalorder %s1260_s20, 1  ;;  %p269_p9 = scmp.lt.s32.totalorder %s1260_s20, 3 }
  0x35   : > { %p270_p11 = pnand %p934_p4, %p269_p9 }
  0x36   : > { %s1407_s25 = sand.u32 (!%p270_p11), 1, %s1244_s16  }
  0x37   : > { %273 = sbr.rel (%p270_p11) target bundleno = 560 (0x230), region = 55  ;;  %s935_s5 = sshll.u32 (!%p270_p11), %s1407_s25, 8 }
  0x38   : > { %s276_s10 = scalar_lea.sflag (!%p270_p11), [#allocation5], %s1407_s25  ;;  %s1411_s12 = scalar_lea.vmem (!%p270_p11), [#allocation4], %s935_s5 }
  0x3e   : > { %1231 = dma.done.wait (%p1343_p8), %s276_s10, 4096  }
  0x3f   : > { %1233 = vsyncadd (%p1343_p8), %s276_s10, 4294963200  ;;  %vm360_vm0 = vcmask 130048   ;;  %v1266_v4 = vmov 0.0   ;;  %v518_v5 = vld [vmem:[%s1596_s2] sm:$0xff]  ;;  %v519_v6 = vld [vmem:[%s1596_s2 + $0x8] sm:$0xff]  ;;  %s937_s10 = sshll.u32 %s1407_s25, 6 }
  0x40   : > { %473 = vmatprep.mubr.f32.mxu0 %v1266_v4  ;;  %362 = vst.msk [vmem:[#allocation3 + $0x8] sm:$0xff] %vm360_vm0, %v1266_v4  ;;  %361 = vst.msk [vmem:[#allocation3] sm:$0xff] %vm360_vm0, %v1266_v4  ;;  %v520_v7 = vld [vmem:[%s1596_s2 + $0x10] sm:$0xff]  ;;  %v1040_v8 = vpack.c.bf16 %v519_v6, %v518_v5  ;;  %v521_v9 = vld [vmem:[%s1596_s2 + $0x18] sm:$0xff]  ;;  %s327_s13 = scalar_lea.vmem [#allocation8], %s937_s10  ;;  %s949_s27 = sshll.u32 %s1252_s18, 8 }
  0x41   : > { %363 = vst.msk [vmem:[#allocation3 + $0x10] sm:$0xff] %vm360_vm0, %v1266_v4  ;;  %364 = vst.msk [vmem:[#allocation3 + $0x18] sm:$0xff] %vm360_vm0, %v1266_v4  ;;  %v1044_v10 = vpack.c.bf16 %v521_v9, %v520_v7  ;;  %v522_v11 = vld [vmem:[%s1596_s2 + $0x20] sm:$0xff]  ;;  %v523_v12 = vld [vmem:[%s1596_s2 + $0x28] sm:$0xff]  ;;  %s781_s11 = sshll.u32 %s327_s13, 4  ;;  %s1545_s22 = scalar_lea.hbm %s1598_s4, %s949_s27  ;;  %s1540_s11 = int_to_ptr.vmem [resolvable:$true] %s781_s11 }
  0x42   : > { %1041 = vmatprep.subr.bf16.mxu1 %v1040_v8  ;;  %v1048_v13 = vpack.c.bf16 %v523_v12, %v522_v11  ;;  %v1447_v14 = vld [vmem:[%s1594_s0] sm:$0xff]  ;;  %v524_v15 = vld [vmem:[%s1596_s2 + $0x30] sm:$0xff]  ;;  %v525_v16 = vld [vmem:[%s1596_s2 + $0x38] sm:$0xff]  ;;  %s765_s24 = scalar_lea.sflag [#allocation6], %s1407_s25  ;;  %s1178_s18 = scalar_lea.vmem %s1540_s11, 1024 }
  0x43   : > { %1043 = vmatpush3.bf16.msra.mxu1 %v1040_v8  ;;  %1002 = vmatprep.mubr.f32.mxu1 %v1447_v14  ;;  %v378_v17 = vld [vmem:[%s1411_s12 + $0x8] sm:$0xff]  ;;  %v380_v18 = vld [vmem:[%s1411_s12 + $0x18] sm:$0xff]  ;;  %v377_v19 = vld [vmem:[%s1411_s12] sm:$0xff]  ;;  %v1052_v26 = vpack.c.bf16 %v525_v16, %v524_v15  ;;  %p1179_p8 = scmp.ne.s32.totalorder %s1540_s11, %s1178_s18  ;;  %p1605_p12 = scmp.ne.s32.totalorder %s1603_s28, 0 }
  0x44   : > { %1045 = vmatprep.subr.bf16.mxu1 %v1044_v10  ;;  %v379_v20 = vld [vmem:[%s1411_s12 + $0x10] sm:$0xff]  ;;  %v1008_v21 = vpack.c.bf16 %v380_v18, %v378_v17  ;;  %v382_v23 = vld [vmem:[%s1411_s12 + $0x28] sm:$0xff]  ;;  %v384_v24 = vld [vmem:[%s1411_s12 + $0x38] sm:$0xff]  ;;  %s1267_s26 = smov [#allocation8]  }
  0x45   : > { %v1010_v22 = vpack.c.bf16 %v379_v20, %v377_v19  ;;  %v381_v25 = vld [vmem:[%s1411_s12 + $0x20] sm:$0xff]  ;;  %v1012_v27 = vpack.c.bf16 %v384_v24, %v382_v23  ;;  %v383_v28 = vld [vmem:[%s1411_s12 + $0x30] sm:$0xff]  ;;  %v386_v29 = vld [vmem:[%s1411_s12 + $0x48] sm:$0xff]  ;;  %p1180_p1 = pnand %p1179_p8, %p1605_p12  ;;  %s1182_s6 = sshll.u32 %s1267_s26, 4  ;;  %s1183_s6 = int_to_ptr.vmem [resolvable:$false] %s1182_s6 }
  0x46   : > { %v388_v30 = vld [vmem:[%s1411_s12 + $0x58] sm:$0xff]  ;;  %v526_v31 = vld [vmem:[%s1596_s2 + $0x40] sm:$0xff]  ;;  %v527_v32 = vld [vmem:[%s1596_s2 + $0x48] sm:$0xff]  ;;  %1009 = vmatprep.subr.bf16.mxu0 %v1008_v21  ;;  %v1014_v33 = vpack.c.bf16 %v383_v28, %v381_v25  ;;  %s1184_s7 = scalar_lea.vmem %s1183_s6, 2048  ;;  %p1185_p6 = scmp.lt.s32.totalorder %s1540_s11, %s1183_s6 }
  0x47   : > { %1047 = vmatpush3.bf16.msra.mxu1 %v1044_v10  ;;  %1011 = vmatpush1.bf16.msra.mxu0 %v1010_v22  ;;  %v1016_v34 = vpack.c.bf16 %v388_v30, %v386_v29  ;;  %v385_v35 = vld [vmem:[%s1411_s12 + $0x40] sm:$0xff]  ;;  %v387_v36 = vld [vmem:[%s1411_s12 + $0x50] sm:$0xff]  ;;  %v1056_v37 = vpack.c.bf16 %v527_v32, %v526_v31  ;;  %v390_v38 = vld [vmem:[%s1411_s12 + $0x68] sm:$0xff]  ;;  %p1181_p5 = pneg %p1180_p1  ;;  %p1186_p7 = scmp.lt.s32.totalorder %s1184_s7, %s1178_s18 }
  0x48   : > { %1049 = vmatprep.subr.bf16.mxu1 %v1048_v13  ;;  %1013 = vmatprep.subr.bf16.mxu0 %v1012_v27  ;;  %v392_v39 = vld [vmem:[%s1411_s12 + $0x78] sm:$0xff]  ;;  %v528_v40 = vld [vmem:[%s1596_s2 + $0x50] sm:$0xff]  ;;  %v1018_v42 = vpack.c.bf16 %v387_v36, %v385_v35  ;;  %v389_v44 = vld [vmem:[%s1411_s12 + $0x60] sm:$0xff] }
  0x49   : > { %v529_v41 = vld [vmem:[%s1596_s2 + $0x58] sm:$0xff]  ;;  %v1020_v43 = vpack.c.bf16 %v392_v39, %v390_v38  ;;  %v391_v45 = vld [vmem:[%s1411_s12 + $0x70] sm:$0xff]  ;;  %v394_v47 = vld [vmem:[%s1411_s12 + $0x88] sm:$0xff]  ;;  %p1187_p10 = por %p1186_p7, %p1185_p6 }
  0x4a   : > { %v1060_v46 = vpack.c.bf16 %v529_v41, %v528_v40  ;;  %v396_v48 = vld [vmem:[%s1411_s12 + $0x98] sm:$0xff]  ;;  %v530_v49 = vld [vmem:[%s1596_s2 + $0x60] sm:$0xff]  ;;  %v531_v50 = vld [vmem:[%s1596_s2 + $0x68] sm:$0xff]  ;;  %v1022_v51 = vpack.c.bf16 %v391_v45, %v389_v44 }
  0x4b   : > { %1051 = vmatpush3.bf16.msra.mxu1 %v1048_v13  ;;  %1015 = vmatpush1.bf16.msra.mxu0 %v1014_v33  ;;  %v1024_v52 = vpack.c.bf16 %v396_v48, %v394_v47  ;;  %v393_v53 = vld [vmem:[%s1411_s12 + $0x80] sm:$0xff]  ;;  %v395_v54 = vld [vmem:[%s1411_s12 + $0x90] sm:$0xff]  ;;  %v1064_v55 = vpack.c.bf16 %v531_v50, %v530_v49  ;;  %v398_v56 = vld [vmem:[%s1411_s12 + $0xa8] sm:$0xff]  ;;  %p1188_p13 = pnand %p1187_p10, %p1181_p5 }
  0x4c   : > { %1053 = vmatprep.subr.bf16.mxu1 %v1052_v26  ;;  %1017 = vmatprep.subr.bf16.mxu0 %v1016_v34  ;;  %v400_v57 = vld [vmem:[%s1411_s12 + $0xb8] sm:$0xff]  ;;  %v532_v58 = vld [vmem:[%s1596_s2 + $0x70] sm:$0xff]  ;;  %v1026_v60 = vpack.c.bf16 %v395_v54, %v393_v53  ;;  %v397_v62 = vld [vmem:[%s1411_s12 + $0xa0] sm:$0xff] }
  0x4d   : > { %v533_v59 = vld [vmem:[%s1596_s2 + $0x78] sm:$0xff]  ;;  %v1028_v61 = vpack.c.bf16 %v400_v57, %v398_v56  ;;  %v399_v63 = vld [vmem:[%s1411_s12 + $0xb0] sm:$0xff]  ;;  %v402_v1 = vld [vmem:[%s1411_s12 + $0xc8] sm:$0xff] }
  0x4e   : > { %v1068_v0 = vpack.c.bf16 %v533_v59, %v532_v58  ;;  %v404_v2 = vld [vmem:[%s1411_s12 + $0xd8] sm:$0xff]  ;;  %v1030_v3 = vpack.c.bf16 %v399_v63, %v397_v62  ;;  %v401_v6 = vld [vmem:[%s1411_s12 + $0xc0] sm:$0xff]  ;;  %v403_v7 = vld [vmem:[%s1411_s12 + $0xd0] sm:$0xff] }
  0x4f   : > { %1055 = vmatpush3.bf16.msra.mxu1 %v1052_v26  ;;  %1019 = vmatpush1.bf16.msra.mxu0 %v1018_v42  ;;  %v1032_v5 = vpack.c.bf16 %v404_v2, %v402_v1  ;;  %v406_v8 = vld [vmem:[%s1411_s12 + $0xe8] sm:$0xff]  ;;  %v408_v9 = vld [vmem:[%s1411_s12 + $0xf8] sm:$0xff]  ;;  %v1034_v10 = vpack.c.bf16 %v403_v7, %v401_v6  ;;  %v405_v13 = vld [vmem:[%s1411_s12 + $0xe0] sm:$0xff] }
  0x50   : > { %1057 = vmatprep.subr.bf16.mxu1 %v1056_v37  ;;  %1021 = vmatprep.subr.bf16.mxu0 %v1020_v43  ;;  %v366_v11 = vld [vmem:[%s1594_s0 + $0x8] sm:$0xff]  ;;  %v1036_v12 = vpack.c.bf16 %v408_v9, %v406_v8  ;;  %v407_v15 = vld [vmem:[%s1411_s12 + $0xf0] sm:$0xff]  ;;  %v368_v18 = vld [vmem:[%s1594_s0 + $0x18] sm:$0xff]  ;;  %s936_s12 = sshll.u32 %s1407_s25, 5 }
  0x51   : > { %v367_v16 = vld [vmem:[%s1594_s0 + $0x10] sm:$0xff]  ;;  %v1038_v17 = vpack.c.bf16 %v407_v15, %v405_v13  ;;  %s287_s5 = scalar_lea.vmem [#allocation7], %s936_s12  ;;  %v514_v25 = vld [vmem:[#allocation3] sm:$0xff]  ;;  %v517_v30 = vld [vmem:[#allocation3 + $0x18] sm:$0xff] }
  0x52   : > { %v644_v19 = vld [vmem:[%s287_s5 + $0x8] sm:$0xff]  ;;  %v646_v20 = vld [vmem:[%s287_s5 + $0x18] sm:$0xff]  ;;  %v643_v22 = vld [vmem:[%s287_s5] sm:$0xff] }
  0x53   : > { %1059 = vmatpush3.bf16.msra.mxu1 %v1056_v37  ;;  %1023 = vmatpush1.bf16.msra.mxu0 %v1022_v51  ;;  %v1072_v21 = vpack.c.bf16 %v646_v20, %v644_v19  ;;  %v645_v23 = vld [vmem:[%s287_s5 + $0x10] sm:$0xff] }
  0x54   : > { %1061 = vmatprep.subr.bf16.mxu1 %v1060_v46  ;;  %1025 = vmatprep.subr.bf16.mxu0 %v1024_v52  ;;  %v1074_v24 = vpack.c.bf16 %v645_v23, %v643_v22  ;;  %v516_v31 = vld [vmem:[#allocation3 + $0x10] sm:$0xff] }
  0x57   : > { %1063 = vmatpush3.bf16.msra.mxu1 %v1060_v46  ;;  %1027 = vmatpush1.bf16.msra.mxu0 %v1026_v60 }
  0x58   : > { %1065 = vmatprep.subr.bf16.mxu1 %v1064_v55  ;;  %1029 = vmatprep.subr.bf16.mxu0 %v1028_v61 }
  0x5b   : > { %1067 = vmatpush3.bf16.msra.mxu1 %v1064_v55  ;;  %1031 = vmatpush1.bf16.msra.mxu0 %v1030_v3 }
  0x5c   : > { %1069 = vmatprep.subr.bf16.mxu1 %v1068_v0  ;;  %1033 = vmatprep.subr.bf16.mxu0 %v1032_v5 }
  0x5f   : > { %1071 = vmatpush3.bf16.msra.mxu1 %v1068_v0  ;;  %1035 = vmatpush1.bf16.msra.mxu0 %v1034_v10 }
  0x60   : > { %1037 = vmatprep.subr.bf16.mxu0 %v1036_v12  ;;  %1076 = vmatprep.subr.bf16.mxu1 %v1072_v21 }
  0x62   : > { %1003 = vmatmul.mubr.f32.vlgmr.msra.gmra.mrb[0].mxu1 %v366_v11 }
  0x63   : > { %1005 = vmatprep.mubr.f32.mxu1 %v367_v16  ;;  %1039 = vmatpush1.bf16.msra.mxu0 %v1038_v17 }
  0x64   : > { %1073 = vmatprep.subr.bf16.mxu0 %v1072_v21  ;;  %1077 = vmatpush1.bf16.msra.mxu1 %v1074_v24 }
  0x66   : > { %1006 = vmatmul.mubr.f32.gmra.mrb[2].mxu1 %v368_v18  ;;  %474 = vmatmul.mubr.f32.vlgmr.msra.gmra.mrb[0].mxu0 %v1447_v14  ;;  %v515_v14 = vld [vmem:[#allocation3 + $0x8] sm:$0xff] }
  0x67   : > { %729 = vmatprep.mubr.f32.mxu1 %v1266_v4  ;;  %479 = vmatprep.mubr.f32.mxu0 %v1266_v4 }
  0x68   : > { %1075 = vmatpush1.bf16.msra.mxu0 %v1074_v24 }
  0x6a   : > { %480 = vmatmul.mubr.f32.gmra.mrb[2].mxu0 %v366_v11 }
  0x6b   : > { %485 = vmatprep.mubr.f32.mxu0 %v1266_v4 }
  0x6e   : > { %486 = vmatmul.mubr.f32.gmra.mrb[4].mxu0 %v367_v16 }
  0x6f   : > { %491 = vmatprep.mubr.f32.mxu0 %v1266_v4 }
  0x72   : > { %492 = vmatmul.mubr.f32.gmra.mrb[6].mxu0 %v368_v18 }
  0x73   : > { %723 = vmatprep.mubr.f32.mxu0 %v1266_v4 }
 0x135   : > { %v1004_v26 = vpop.f32.mrb[0].mxu1 }
 0x136   : > { %v620_v27 = vadd.f32 %v1004_v26, %v515_v14  ;;  %v600_v28 = vpop.f32.mrb[1].mxu1 }
 0x137   : > { %v619_v29 = vadd.f32 %v600_v28, %v514_v25 }
 0x138   : > { %625 = vst.msk [vmem:[#allocation3 + $0x8] sm:$0xff] %vm360_vm0, %v620_v27 }
 0x139   : > { %624 = vst.msk [vmem:[#allocation3] sm:$0xff] %vm360_vm0, %v619_v29  ;;  %v1007_v32 = vpop.f32.mrb[2].mxu1 }
 0x13a   : > { %v622_v33 = vadd.f32 %v1007_v32, %v517_v30  ;;  %v610_v34 = vpop.f32.mrb[3].mxu1 }
 0x13b   : > { %v621_v35 = vadd.f32 %v610_v34, %v516_v31 }
 0x13c   : > { %627 = vst.msk [vmem:[#allocation3 + $0x18] sm:$0xff] %vm360_vm0, %v622_v33 }
 0x13d   : > { %626 = vst.msk [vmem:[#allocation3 + $0x10] sm:$0xff] %vm360_vm0, %v621_v35  ;;  %v481_v38 = vpop.f32.mrb[2].mxu0 }
 0x13e   : > { %v483_v39 = vpop.f32.mrb[3].mxu0 }
 0x13f   : > { %v640_v36 = vld [vmem:[#allocation3 + $0x8] sm:$0xff] }
 0x140   : > { %939 = vmatmul.mubr.msk.f32.vlgmr.msra.gmra.mrb[4].mxu1 %vm360_vm0, %v640_v36  ;;  %v639_v37 = vld [vmem:[#allocation3] sm:$0xff] }
 0x141   : > { %938 = vmatmul.mubr.msk.f32.vlgmr.msra.gmra.mrb[0].mxu0 %vm360_vm0, %v639_v37  ;;  %735 = vmatprep.mubr.f32.mxu1 %v1266_v4  ;;  %v487_v41 = vpop.f32.mrb[4].mxu0 }
 0x142   : > { %v489_v42 = vpop.f32.mrb[5].mxu0 }
 0x143   : > { %v642_v43 = vld [vmem:[#allocation3 + $0x18] sm:$0xff] }
 0x144   : > { %v641_v40 = vld [vmem:[#allocation3 + $0x10] sm:$0xff] }
 0x145   : > { %940 = vmatmul.mubr.msk.f32.gmra.mrb[6].mxu1 %vm360_vm0, %v641_v40  ;;  %v493_v44 = vpop.f32.mrb[6].mxu0 }
 0x146   : > { %741 = vmatprep.mubr.f32.mxu1 %v1266_v4  ;;  %v495_v45 = vpop.f32.mrb[7].mxu0 }
 0x149   : > { %941 = vmatmul.mubr.msk.f32.gmra.mrb[8].mxu1 %vm360_vm0, %v642_v43 }
 0x213   : > { %v731_v46 = vpop.f32.mrb[4].mxu1 }
 0x214   : > { %v750_v47 = vadd.f32 %v731_v46, %v481_v38  ;;  %v725_v48 = vpop.f32.mrb[0].mxu0  ;;  %v733_v49 = vpop.f32.mrb[5].mxu1 }
 0x215   : > { %756 = vst [vmem:[%s327_s13] sm:$0xff] %v725_v48  ;;  %v751_v50 = vadd.f32 %v733_v49, %v483_v39  ;;  %v727_v51 = vpop.f32.mrb[1].mxu0 }
 0x216   : > { %758 = vst [vmem:[%s327_s13 + $0x10] sm:$0xff] %v750_v47  ;;  %757 = vst [vmem:[%s327_s13 + $0x8] sm:$0xff] %v727_v51 }
 0x217   : > { %759 = vst [vmem:[%s327_s13 + $0x18] sm:$0xff] %v751_v50 }
 0x218   : > { %v737_v52 = vpop.f32.mrb[6].mxu1 }
 0x219   : > { %v752_v4 = vadd.f32 %v737_v52, %v487_v41  ;;  %v739_v53 = vpop.f32.mrb[7].mxu1 }
 0x21a   : > { %v753_v54 = vadd.f32 %v739_v53, %v489_v42 }
 0x21b   : > { %760 = vst [vmem:[%s327_s13 + $0x20] sm:$0xff] %v752_v4 }
 0x21c   : > { %761 = vst [vmem:[%s327_s13 + $0x28] sm:$0xff] %v753_v54  ;;  %v743_v55 = vpop.f32.mrb[8].mxu1 }
 0x21d   : > { %v754_v56 = vadd.f32 %v743_v55, %v493_v44  ;;  %v745_v57 = vpop.f32.mrb[9].mxu1 }
 0x21e   : > { %v755_v58 = vadd.f32 %v745_v57, %v495_v45 }
 0x21f   : > { %762 = vst [vmem:[%s327_s13 + $0x30] sm:$0xff] %v754_v56 }
 0x220   : > { %763 = vst [vmem:[%s327_s13 + $0x38] sm:$0xff] %v755_v58 }
 0x221   : > { %1191 = shalt.err (!%p1188_p13)
}
 0x222   : > { %s1192_s8 = scalar_lea.hbm %s1545_s22, 1024  ;;  %s1196_s5 = scalar_lea.hbm %s1598_s4, 2048 }
 0x223   : > { %p1193_p0 = scmp.ne.s32.totalorder %s1545_s22, %s1192_s8  ;;  %p1197_p4 = scmp.lt.u32.totalorder %s1545_s22, %s1598_s4 }
 0x224   : > { %p1198_p9 = scmp.lt.u32.totalorder %s1196_s5, %s1192_s8  ;;  %p1200_p8 = scmp.lt.u32.totalorder %s1192_s8, %s1545_s22 }
 0x225   : > { %p1194_p2 = pnand %p1193_p0, %p1605_p12 }
 0x226   : > { %p1199_p11 = por %p1198_p9, %p1197_p4 }
 0x227   : > { %p1195_p3 = pneg %p1194_p2 }
 0x228   : > { %p1201_p1 = por %p1200_p8, %p1199_p11 }
 0x22a   : > { %p1202_p5 = pnand %p1201_p1, %p1195_p3 }
 0x22c   : > { %1205 = shalt.err (!%p1202_p5)
}
 0x22d   : > { %s1268_s27 = smov 256   ;;  %s1269_s14 = smov 512  }
 0x22e   : > { %s1270_s21 = smov 16  }
 0x22f   : > { %1088 = dma.vmem_to_hbm [thread:$0]  (%p1605_p12), %s1540_s11, 1024, %s1545_s22, %s765_s24, %s1268_s27, %s1269_s14, %s1270_s21  }
 0x230 PF: > { %s796_s18 = sand.u32 1, %s1240_s15   ;;  %p1606_p6 = scmp.ne.s32.totalorder %s1604_s30, 0 }
 0x231   : > { %p1607_p7 = scmp.ge.s32.totalorder %s1260_s20, 2  ;;  %s797_s26 = scalar_lea.sflag [#allocation6], %s796_s18 }
 0x233   : > { %p1091_p10 = pnand %p1607_p7, %p1606_p6 }
 0x235   : > { %1235 = dma.done.wait (!%p1091_p10), %s797_s26, 1024  }
 0x236   : > { %1237 = vsyncadd (!%p1091_p10), %s797_s26, 4294966272  ;;  %s20_s20 = sadd.s32 1, %s1260_s20   ;;  %s1608_s15 = smov %s1244_s16 }
 0x237   : > { %p17_p13 = scmp.ge.s32.totalorder %s20_s20, 4   ;;  %s1609_s16 = smov %s1248_s17 }
 0x238   : > { %s1610_s17 = smov %s1352_s29  ;;  %s1611_s18 = smov %s1256_s19 }
 0x239   : > { %s1612_s19 = smov %s1614_s23  ;;  %19 = sbr.rel (!%p17_p13) target bundleno = 6 (0x6), region = 126 }
 0x240   :  { %802 = vsyncpa [#allocation5], 1 }
 0x241   :  { %804 = vsyncpa [#allocation5 + $0x1], 1 }
 0x242   :  { %805 = vsyncpa [#allocation6], 1 }
 0x243   :  { %807 = vsyncpa [#allocation6 + $0x1], 1 }

</bundles_post_ra>
